<compile_context>
chip_gen: v6e
topology: v6e:2x2x1
jax: 0.10.0
libtpu: 0.0.40
codegen_flags: <defaults>
</compile_context>

<pallas_src>
import jax
import jax.numpy as jnp
from jax.experimental import pallas as pl
from jax.experimental.pallas import tpu as pltpu


def _bert_cnn_head_kernel(x_ref, w_ref, b_ref, out_ref):
    """Fused Conv2d(1->C, (K, H), pad=(K//2, 0)) + ReLU + seq-max-pool.

    x_ref  : (1, TB, S+K-1, H) bf16  seq-padded hidden states, TB batch elements
    w_ref  : (K, H, Cp)        bf16  conv weights (tap, hidden, padded out-chan)
    b_ref  : (1, Cp)           f32   conv bias (zeros in the padded channels)
    out_ref: (1, TB, Cp)       f32   per-sequence max-pooled ReLU(conv) features
    """
    _, TB, S_pad, _ = x_ref.shape
    K, _, Cp = w_ref.shape
    S = S_pad - K + 1

    for t in range(TB):                  # static unroll over the batch block
        x = x_ref[0, t]                  # (S_pad, H) bf16 — full rows, aligned
        acc = jnp.zeros((S, Cp), dtype=jnp.float32)
        for k in range(K):               # static unroll over the K=11 conv taps
            # Aligned full-row MXU matmul (bf16 in, f32 accumulate). The conv's
            # sequence shift is applied to the small (S_pad, Cp) *result*, not
            # by slicing the big (S_pad, H) LHS at sublane offsets.
            y = jnp.dot(x, w_ref[k], preferred_element_type=jnp.float32)
            acc = acc + y[k:k + S, :]
        acc = jnp.maximum(acc + b_ref[...], 0.0)            # conv bias + ReLU
        # max_pool2d over the full sequence -> one lane-dense (1, Cp) row.
        out_ref[0, t:t + 1, :] = jnp.max(acc, axis=0, keepdims=True)
        # TODO(synk): for long sequences (S ~ 512) additionally tile S with a
        # running max so the f32 accumulator stays within a few vregs.


def _pick_batch_block(B):
    """Batch elements per grid step: amortize per-step overhead while keeping
    >= 2 grid steps so the 'parallel' batch axis feeds both v7x TensorCores."""
    for tb in (8, 4, 2):
        if B % tb == 0 and B // tb >= 2:
            return tb
    return 1


def bert_cnn_head(hidden_states, conv_w, conv_b, cls_w, cls_b, *,
                  kernel_size=11, batch_block=None):
    """hidden_states: [B, S, H] (BERT sequence output).

    conv_w: [C, K, H]   (PyTorch Conv2d weight [C, 1, K, H], in-channel squeezed)
    conv_b: [C]
    cls_w : [N, C]      (PyTorch Linear weight)
    cls_b : [N]
    returns logits [B, N] float32
    """
    B, S, H = hidden_states.shape
    C, K, _ = conv_w.shape
    assert K == kernel_size
    pad = K // 2
    S_pad = S + K - 1

    TB = batch_block if batch_block is not None else _pick_batch_block(B)
    assert B % TB == 0
    G = B // TB

    # Conv out-channels padded up to a multiple of 128 lanes (>= 128); the
    # padded channels are exactly zero end-to-end.
    Cp = max(128, ((C + 127) // 128) * 128)

    # bf16 activations & weights on the MXU (f32 accumulation in-kernel). The
    # SAME-padding pad rides the same XLA fusion as the bf16 cast.
    x = jnp.pad(hidden_states.astype(jnp.bfloat16),
                ((0, 0), (pad, pad), (0, 0)))               # [B, S_pad, H] bf16
    x = x.reshape(G, TB, S_pad, H)

    w_khc = jnp.transpose(conv_w, (1, 2, 0))                # [K, H, C]
    w_khc = jnp.pad(w_khc, ((0, 0), (0, 0), (0, Cp - C))).astype(jnp.bfloat16)
    b_1c = jnp.pad(conv_b, (0, Cp - C)).reshape(1, Cp).astype(jnp.float32)

    # Explicit VMEM budget (double-buffered blocks + headroom) so block sizes
    # stay honest on v7x's smaller VMEM if TB / S are scaled up.
    block_bytes = (2 * TB * S_pad * H * 2        # activations, bf16, 2 buffers
                   + 2 * K * H * Cp * 2          # conv weights, bf16, 2 buffers
                   + 2 * Cp * 4                  # conv bias
                   + 2 * TB * Cp * 4)            # pooled output block
    vmem_limit = int(min(96 * 1024 * 1024,
                         max(32 * 1024 * 1024, 4 * block_bytes)))

    pooled = pl.pallas_call(
        _bert_cnn_head_kernel,
        out_shape=jax.ShapeDtypeStruct((G, TB, Cp), jnp.float32),
        grid_spec=pltpu.PrefetchScalarGridSpec(
            num_scalar_prefetch=0,
            grid=(G,),
            in_specs=[
                pl.BlockSpec((1, TB, S_pad, H), lambda g: (g, 0, 0, 0)),  # acts
                pl.BlockSpec((K, H, Cp), lambda g: (0, 0, 0)),   # shared weights
                pl.BlockSpec((1, Cp), lambda g: (0, 0)),         # shared bias
            ],
            out_specs=pl.BlockSpec((1, TB, Cp), lambda g: (g, 0, 0)),
        ),
        compiler_params=pltpu.CompilerParams(
            dimension_semantics=("parallel",),
            vmem_limit_bytes=vmem_limit,
        ),
    )(x, w_khc, b_1c)

    pooled = pooled.reshape(B, Cp)[:, :C]        # drop the zero-padded channels

    # Tiny Linear(C -> N): one batched f32 matmul in plain XLA. Keeping it out
    # of the kernel avoids a lane-sparse (1, N) per-step output (masked partial
    # stores) and a degenerate M=1 MXU push per grid step.
    logits = pooled @ cls_w.astype(jnp.float32).T + cls_b.astype(jnp.float32)[None, :]
    return logits


def _reference(hidden_states, conv_w, conv_b, cls_w, cls_b):
    """Plain-JAX f32 reference mirroring the PyTorch head (correctness check)."""
    B, S, H = hidden_states.shape
    C, K, _ = conv_w.shape
    pad = K // 2
    x_pad = jnp.pad(hidden_states, ((0, 0), (pad, pad), (0, 0)))
    conv = jnp.zeros((B, S, C), jnp.float32)
    for k in range(K):
        conv = conv + jnp.einsum("bsh,ch->bsc", x_pad[:, k:k + S, :], conv_w[:, k, :])
    conv = jax.nn.relu(conv + conv_b[None, None, :])
    pooled = jnp.max(conv, axis=1)                       # [B, C]
    return pooled @ cls_w.T + cls_b[None, :]             # [B, N]


if __name__ == "__main__":
    # Small, BERT-consistent shapes: batch=4, seq=8, hidden=32,
    # conv out_channels=64, kernel height=11, num_labels=3.
    B, S, H = 4, 8, 32
    C, K, N = 64, 11, 3

    key = jax.random.PRNGKey(0)
    k_x, k_w, k_b, k_cw, k_cb = jax.random.split(key, 5)

    hidden_states = jax.random.normal(k_x, (B, S, H), dtype=jnp.float32)
    conv_w = jax.random.normal(k_w, (C, K, H), dtype=jnp.float32) * 0.05
    conv_b = jax.random.normal(k_b, (C,), dtype=jnp.float32) * 0.05
    cls_w = jax.random.normal(k_cw, (N, C), dtype=jnp.float32) * 0.05
    cls_b = jax.random.normal(k_cb, (N,), dtype=jnp.float32) * 0.05

    logits = bert_cnn_head(hidden_states, conv_w, conv_b, cls_w, cls_b, kernel_size=K)
    logits = jax.block_until_ready(logits)

    ref = _reference(hidden_states, conv_w, conv_b, cls_w, cls_b)
    assert logits.shape == (B, N)
    # bf16 activations/weights -> relaxed tolerance vs the f32 reference.
    assert jnp.allclose(logits, ref, atol=5e-2, rtol=5e-2), "mismatch vs reference"

    print("KERNEL_OK")
</pallas_src>

<mosaic_0001>
module attributes {stable_mosaic.version = 11 : i64} {
  func.func @_bert_cnn_head_kernel(%arg0: i32, %arg1: memref<1x2x18x32xbf16, #tpu.memory_space<vmem>>, %arg2: memref<11x32x128xbf16, #tpu.memory_space<vmem>>, %arg3: memref<1x128xf32, #tpu.memory_space<vmem>>, %arg4: memref<1x2x128xf32, #tpu.memory_space<vmem>>) attributes {dimension_semantics = [#tpu.dimension_semantics<parallel>], iteration_bounds = array<i64: 2>, scalar_prefetch = 0 : i64, scratch_operands = 0 : i64, tpu.core_type = #tpu.core_type<tc>, window_params = [{transform_indices = @transform_0, window_bounds = array<i64: 1, 2, 18, 32>}, {pipeline_mode = #tpu.pipeline_mode<synchronous>, transform_indices = @transform_1, window_bounds = array<i64: 11, 32, 128>}, {pipeline_mode = #tpu.pipeline_mode<synchronous>, transform_indices = @transform_2, window_bounds = array<i64: 1, 128>}, {transform_indices = @transform_3, window_bounds = array<i64: 1, 2, 128>}]} {
    %c0 = arith.constant 0 : index
    %c0_0 = arith.constant 0 : index
    %c0_1 = arith.constant 0 : index
    %c0_2 = arith.constant 0 : index
    %0 = vector.load %arg1[%c0, %c0_0, %c0_1, %c0_2] : memref<1x2x18x32xbf16, #tpu.memory_space<vmem>>, vector<1x1x18x32xbf16>
    %1 = vector.shape_cast %0 : vector<1x1x18x32xbf16> to vector<18x32xbf16>
    %cst = arith.constant 0.000000e+00 : f32
    %2 = vector.broadcast %cst : f32 to vector<8x128xf32>
    %c0_3 = arith.constant 0 : index
    %c0_4 = arith.constant 0 : index
    %c0_5 = arith.constant 0 : index
    %3 = vector.load %arg2[%c0_3, %c0_4, %c0_5] : memref<11x32x128xbf16, #tpu.memory_space<vmem>>, vector<1x32x128xbf16>
    %4 = vector.shape_cast %3 : vector<1x32x128xbf16> to vector<32x128xbf16>
    %cst_6 = arith.constant dense<0.000000e+00> : vector<18x128xf32>
    %5 = tpu.matmul %1, %4, %cst_6 {dimension_numbers = #tpu.dot_dimension_numbers<[1], [0], [0], [1], [0, 0, 1, 1], [], []>} : vector<18x32xbf16>, vector<32x128xbf16>, vector<18x128xf32> -> vector<18x128xf32>
    %6 = vector.extract_strided_slice %5 {offsets = [0, 0], sizes = [8, 128], strides = [1, 1]} : vector<18x128xf32> to vector<8x128xf32>
    %7 = arith.addf %2, %6 : vector<8x128xf32>
    %c1 = arith.constant 1 : index
    %c0_7 = arith.constant 0 : index
    %c0_8 = arith.constant 0 : index
    %8 = vector.load %arg2[%c1, %c0_7, %c0_8] : memref<11x32x128xbf16, #tpu.memory_space<vmem>>, vector<1x32x128xbf16>
    %9 = vector.shape_cast %8 : vector<1x32x128xbf16> to vector<32x128xbf16>
    %cst_9 = arith.constant dense<0.000000e+00> : vector<18x128xf32>
    %10 = tpu.matmul %1, %9, %cst_9 {dimension_numbers = #tpu.dot_dimension_numbers<[1], [0], [0], [1], [0, 0, 1, 1], [], []>} : vector<18x32xbf16>, vector<32x128xbf16>, vector<18x128xf32> -> vector<18x128xf32>
    %11 = vector.extract_strided_slice %10 {offsets = [1, 0], sizes = [8, 128], strides = [1, 1]} : vector<18x128xf32> to vector<8x128xf32>
    %12 = arith.addf %7, %11 : vector<8x128xf32>
    %c2 = arith.constant 2 : index
    %c0_10 = arith.constant 0 : index
    %c0_11 = arith.constant 0 : index
    %13 = vector.load %arg2[%c2, %c0_10, %c0_11] : memref<11x32x128xbf16, #tpu.memory_space<vmem>>, vector<1x32x128xbf16>
    %14 = vector.shape_cast %13 : vector<1x32x128xbf16> to vector<32x128xbf16>
    %cst_12 = arith.constant dense<0.000000e+00> : vector<18x128xf32>
    %15 = tpu.matmul %1, %14, %cst_12 {dimension_numbers = #tpu.dot_dimension_numbers<[1], [0], [0], [1], [0, 0, 1, 1], [], []>} : vector<18x32xbf16>, vector<32x128xbf16>, vector<18x128xf32> -> vector<18x128xf32>
    %16 = vector.extract_strided_slice %15 {offsets = [2, 0], sizes = [8, 128], strides = [1, 1]} : vector<18x128xf32> to vector<8x128xf32>
    %17 = arith.addf %12, %16 : vector<8x128xf32>
    %c3 = arith.constant 3 : index
    %c0_13 = arith.constant 0 : index
    %c0_14 = arith.constant 0 : index
    %18 = vector.load %arg2[%c3, %c0_13, %c0_14] : memref<11x32x128xbf16, #tpu.memory_space<vmem>>, vector<1x32x128xbf16>
    %19 = vector.shape_cast %18 : vector<1x32x128xbf16> to vector<32x128xbf16>
    %cst_15 = arith.constant dense<0.000000e+00> : vector<18x128xf32>
    %20 = tpu.matmul %1, %19, %cst_15 {dimension_numbers = #tpu.dot_dimension_numbers<[1], [0], [0], [1], [0, 0, 1, 1], [], []>} : vector<18x32xbf16>, vector<32x128xbf16>, vector<18x128xf32> -> vector<18x128xf32>
    %21 = vector.extract_strided_slice %20 {offsets = [3, 0], sizes = [8, 128], strides = [1, 1]} : vector<18x128xf32> to vector<8x128xf32>
    %22 = arith.addf %17, %21 : vector<8x128xf32>
    %c4 = arith.constant 4 : index
    %c0_16 = arith.constant 0 : index
    %c0_17 = arith.constant 0 : index
    %23 = vector.load %arg2[%c4, %c0_16, %c0_17] : memref<11x32x128xbf16, #tpu.memory_space<vmem>>, vector<1x32x128xbf16>
    %24 = vector.shape_cast %23 : vector<1x32x128xbf16> to vector<32x128xbf16>
    %cst_18 = arith.constant dense<0.000000e+00> : vector<18x128xf32>
    %25 = tpu.matmul %1, %24, %cst_18 {dimension_numbers = #tpu.dot_dimension_numbers<[1], [0], [0], [1], [0, 0, 1, 1], [], []>} : vector<18x32xbf16>, vector<32x128xbf16>, vector<18x128xf32> -> vector<18x128xf32>
    %26 = vector.extract_strided_slice %25 {offsets = [4, 0], sizes = [8, 128], strides = [1, 1]} : vector<18x128xf32> to vector<8x128xf32>
    %27 = arith.addf %22, %26 : vector<8x128xf32>
    %c5 = arith.constant 5 : index
    %c0_19 = arith.constant 0 : index
    %c0_20 = arith.constant 0 : index
    %28 = vector.load %arg2[%c5, %c0_19, %c0_20] : memref<11x32x128xbf16, #tpu.memory_space<vmem>>, vector<1x32x128xbf16>
    %29 = vector.shape_cast %28 : vector<1x32x128xbf16> to vector<32x128xbf16>
    %cst_21 = arith.constant dense<0.000000e+00> : vector<18x128xf32>
    %30 = tpu.matmul %1, %29, %cst_21 {dimension_numbers = #tpu.dot_dimension_numbers<[1], [0], [0], [1], [0, 0, 1, 1], [], []>} : vector<18x32xbf16>, vector<32x128xbf16>, vector<18x128xf32> -> vector<18x128xf32>
    %31 = vector.extract_strided_slice %30 {offsets = [5, 0], sizes = [8, 128], strides = [1, 1]} : vector<18x128xf32> to vector<8x128xf32>
    %32 = arith.addf %27, %31 : vector<8x128xf32>
    %c6 = arith.constant 6 : index
    %c0_22 = arith.constant 0 : index
    %c0_23 = arith.constant 0 : index
    %33 = vector.load %arg2[%c6, %c0_22, %c0_23] : memref<11x32x128xbf16, #tpu.memory_space<vmem>>, vector<1x32x128xbf16>
    %34 = vector.shape_cast %33 : vector<1x32x128xbf16> to vector<32x128xbf16>
    %cst_24 = arith.constant dense<0.000000e+00> : vector<18x128xf32>
    %35 = tpu.matmul %1, %34, %cst_24 {dimension_numbers = #tpu.dot_dimension_numbers<[1], [0], [0], [1], [0, 0, 1, 1], [], []>} : vector<18x32xbf16>, vector<32x128xbf16>, vector<18x128xf32> -> vector<18x128xf32>
    %36 = vector.extract_strided_slice %35 {offsets = [6, 0], sizes = [8, 128], strides = [1, 1]} : vector<18x128xf32> to vector<8x128xf32>
    %37 = arith.addf %32, %36 : vector<8x128xf32>
    %c7 = arith.constant 7 : index
    %c0_25 = arith.constant 0 : index
    %c0_26 = arith.constant 0 : index
    %38 = vector.load %arg2[%c7, %c0_25, %c0_26] : memref<11x32x128xbf16, #tpu.memory_space<vmem>>, vector<1x32x128xbf16>
    %39 = vector.shape_cast %38 : vector<1x32x128xbf16> to vector<32x128xbf16>
    %cst_27 = arith.constant dense<0.000000e+00> : vector<18x128xf32>
    %40 = tpu.matmul %1, %39, %cst_27 {dimension_numbers = #tpu.dot_dimension_numbers<[1], [0], [0], [1], [0, 0, 1, 1], [], []>} : vector<18x32xbf16>, vector<32x128xbf16>, vector<18x128xf32> -> vector<18x128xf32>
    %41 = vector.extract_strided_slice %40 {offsets = [7, 0], sizes = [8, 128], strides = [1, 1]} : vector<18x128xf32> to vector<8x128xf32>
    %42 = arith.addf %37, %41 : vector<8x128xf32>
    %c8 = arith.constant 8 : index
    %c0_28 = arith.constant 0 : index
    %c0_29 = arith.constant 0 : index
    %43 = vector.load %arg2[%c8, %c0_28, %c0_29] : memref<11x32x128xbf16, #tpu.memory_space<vmem>>, vector<1x32x128xbf16>
    %44 = vector.shape_cast %43 : vector<1x32x128xbf16> to vector<32x128xbf16>
    %cst_30 = arith.constant dense<0.000000e+00> : vector<18x128xf32>
    %45 = tpu.matmul %1, %44, %cst_30 {dimension_numbers = #tpu.dot_dimension_numbers<[1], [0], [0], [1], [0, 0, 1, 1], [], []>} : vector<18x32xbf16>, vector<32x128xbf16>, vector<18x128xf32> -> vector<18x128xf32>
    %46 = vector.extract_strided_slice %45 {offsets = [8, 0], sizes = [8, 128], strides = [1, 1]} : vector<18x128xf32> to vector<8x128xf32>
    %47 = arith.addf %42, %46 : vector<8x128xf32>
    %c9 = arith.constant 9 : index
    %c0_31 = arith.constant 0 : index
    %c0_32 = arith.constant 0 : index
    %48 = vector.load %arg2[%c9, %c0_31, %c0_32] : memref<11x32x128xbf16, #tpu.memory_space<vmem>>, vector<1x32x128xbf16>
    %49 = vector.shape_cast %48 : vector<1x32x128xbf16> to vector<32x128xbf16>
    %cst_33 = arith.constant dense<0.000000e+00> : vector<18x128xf32>
    %50 = tpu.matmul %1, %49, %cst_33 {dimension_numbers = #tpu.dot_dimension_numbers<[1], [0], [0], [1], [0, 0, 1, 1], [], []>} : vector<18x32xbf16>, vector<32x128xbf16>, vector<18x128xf32> -> vector<18x128xf32>
    %51 = vector.extract_strided_slice %50 {offsets = [9, 0], sizes = [8, 128], strides = [1, 1]} : vector<18x128xf32> to vector<8x128xf32>
    %52 = arith.addf %47, %51 : vector<8x128xf32>
    %c10 = arith.constant 10 : index
    %c0_34 = arith.constant 0 : index
    %c0_35 = arith.constant 0 : index
    %53 = vector.load %arg2[%c10, %c0_34, %c0_35] : memref<11x32x128xbf16, #tpu.memory_space<vmem>>, vector<1x32x128xbf16>
    %54 = vector.shape_cast %53 : vector<1x32x128xbf16> to vector<32x128xbf16>
    %cst_36 = arith.constant dense<0.000000e+00> : vector<18x128xf32>
    %55 = tpu.matmul %1, %54, %cst_36 {dimension_numbers = #tpu.dot_dimension_numbers<[1], [0], [0], [1], [0, 0, 1, 1], [], []>} : vector<18x32xbf16>, vector<32x128xbf16>, vector<18x128xf32> -> vector<18x128xf32>
    %56 = vector.extract_strided_slice %55 {offsets = [10, 0], sizes = [8, 128], strides = [1, 1]} : vector<18x128xf32> to vector<8x128xf32>
    %57 = arith.addf %52, %56 : vector<8x128xf32>
    %c0_37 = arith.constant 0 : index
    %c0_38 = arith.constant 0 : index
    %58 = vector.load %arg3[%c0_37, %c0_38] : memref<1x128xf32, #tpu.memory_space<vmem>>, vector<1x128xf32>
    %59 = vector.broadcast %58 : vector<1x128xf32> to vector<8x128xf32>
    %60 = arith.addf %57, %59 : vector<8x128xf32>
    %cst_39 = arith.constant 0.000000e+00 : f32
    %61 = vector.broadcast %cst_39 : f32 to vector<8x128xf32>
    %62 = arith.maximumf %60, %61 : vector<8x128xf32>
    %cst_40 = arith.constant dense<0xFF800000> : vector<128xf32>
    %63 = vector.multi_reduction <maximumf>, %62, %cst_40 [0] : vector<8x128xf32> to vector<128xf32>
    %64 = vector.shape_cast %63 : vector<128xf32> to vector<1x128xf32>
    %c0_41 = arith.constant 0 : index
    %c0_42 = arith.constant 0 : index
    %c0_43 = arith.constant 0 : index
    %65 = vector.load %arg4[%c0_41, %c0_42, %c0_43] : memref<1x2x128xf32, #tpu.memory_space<vmem>>, vector<1x1x128xf32>
    %66 = vector.shape_cast %65 : vector<1x1x128xf32> to vector<1x128xf32>
    %67 = vector.shape_cast %64 : vector<1x128xf32> to vector<1x1x128xf32>
    tpu.vector_store %arg4[%c0_41, %c0_42, %c0_43], %67 {strides = array<i32>} : memref<1x2x128xf32, #tpu.memory_space<vmem>>, vector<1x1x128xf32>,
    %c0_44 = arith.constant 0 : index
    %c1_45 = arith.constant 1 : index
    %c0_46 = arith.constant 0 : index
    %c0_47 = arith.constant 0 : index
    %68 = vector.load %arg1[%c0_44, %c1_45, %c0_46, %c0_47] : memref<1x2x18x32xbf16, #tpu.memory_space<vmem>>, vector<1x1x18x32xbf16>
    %69 = vector.shape_cast %68 : vector<1x1x18x32xbf16> to vector<18x32xbf16>
    %cst_48 = arith.constant 0.000000e+00 : f32
    %70 = vector.broadcast %cst_48 : f32 to vector<8x128xf32>
    %c0_49 = arith.constant 0 : index
    %c0_50 = arith.constant 0 : index
    %c0_51 = arith.constant 0 : index
    %71 = vector.load %arg2[%c0_49, %c0_50, %c0_51] : memref<11x32x128xbf16, #tpu.memory_space<vmem>>, vector<1x32x128xbf16>
    %72 = vector.shape_cast %71 : vector<1x32x128xbf16> to vector<32x128xbf16>
    %cst_52 = arith.constant dense<0.000000e+00> : vector<18x128xf32>
    %73 = tpu.matmul %69, %72, %cst_52 {dimension_numbers = #tpu.dot_dimension_numbers<[1], [0], [0], [1], [0, 0, 1, 1], [], []>} : vector<18x32xbf16>, vector<32x128xbf16>, vector<18x128xf32> -> vector<18x128xf32>
    %74 = vector.extract_strided_slice %73 {offsets = [0, 0], sizes = [8, 128], strides = [1, 1]} : vector<18x128xf32> to vector<8x128xf32>
    %75 = arith.addf %70, %74 : vector<8x128xf32>
    %c1_53 = arith.constant 1 : index
    %c0_54 = arith.constant 0 : index
    %c0_55 = arith.constant 0 : index
    %76 = vector.load %arg2[%c1_53, %c0_54, %c0_55] : memref<11x32x128xbf16, #tpu.memory_space<vmem>>, vector<1x32x128xbf16>
    %77 = vector.shape_cast %76 : vector<1x32x128xbf16> to vector<32x128xbf16>
    %cst_56 = arith.constant dense<0.000000e+00> : vector<18x128xf32>
    %78 = tpu.matmul %69, %77, %cst_56 {dimension_numbers = #tpu.dot_dimension_numbers<[1], [0], [0], [1], [0, 0, 1, 1], [], []>} : vector<18x32xbf16>, vector<32x128xbf16>, vector<18x128xf32> -> vector<18x128xf32>
    %79 = vector.extract_strided_slice %78 {offsets = [1, 0], sizes = [8, 128], strides = [1, 1]} : vector<18x128xf32> to vector<8x128xf32>
    %80 = arith.addf %75, %79 : vector<8x128xf32>
    %c2_57 = arith.constant 2 : index
    %c0_58 = arith.constant 0 : index
    %c0_59 = arith.constant 0 : index
    %81 = vector.load %arg2[%c2_57, %c0_58, %c0_59] : memref<11x32x128xbf16, #tpu.memory_space<vmem>>, vector<1x32x128xbf16>
    %82 = vector.shape_cast %81 : vector<1x32x128xbf16> to vector<32x128xbf16>
    %cst_60 = arith.constant dense<0.000000e+00> : vector<18x128xf32>
    %83 = tpu.matmul %69, %82, %cst_60 {dimension_numbers = #tpu.dot_dimension_numbers<[1], [0], [0], [1], [0, 0, 1, 1], [], []>} : vector<18x32xbf16>, vector<32x128xbf16>, vector<18x128xf32> -> vector<18x128xf32>
    %84 = vector.extract_strided_slice %83 {offsets = [2, 0], sizes = [8, 128], strides = [1, 1]} : vector<18x128xf32> to vector<8x128xf32>
    %85 = arith.addf %80, %84 : vector<8x128xf32>
    %c3_61 = arith.constant 3 : index
    %c0_62 = arith.constant 0 : index
    %c0_63 = arith.constant 0 : index
    %86 = vector.load %arg2[%c3_61, %c0_62, %c0_63] : memref<11x32x128xbf16, #tpu.memory_space<vmem>>, vector<1x32x128xbf16>
    %87 = vector.shape_cast %86 : vector<1x32x128xbf16> to vector<32x128xbf16>
    %cst_64 = arith.constant dense<0.000000e+00> : vector<18x128xf32>
    %88 = tpu.matmul %69, %87, %cst_64 {dimension_numbers = #tpu.dot_dimension_numbers<[1], [0], [0], [1], [0, 0, 1, 1], [], []>} : vector<18x32xbf16>, vector<32x128xbf16>, vector<18x128xf32> -> vector<18x128xf32>
    %89 = vector.extract_strided_slice %88 {offsets = [3, 0], sizes = [8, 128], strides = [1, 1]} : vector<18x128xf32> to vector<8x128xf32>
    %90 = arith.addf %85, %89 : vector<8x128xf32>
    %c4_65 = arith.constant 4 : index
    %c0_66 = arith.constant 0 : index
    %c0_67 = arith.constant 0 : index
    %91 = vector.load %arg2[%c4_65, %c0_66, %c0_67] : memref<11x32x128xbf16, #tpu.memory_space<vmem>>, vector<1x32x128xbf16>
    %92 = vector.shape_cast %91 : vector<1x32x128xbf16> to vector<32x128xbf16>
    %cst_68 = arith.constant dense<0.000000e+00> : vector<18x128xf32>
    %93 = tpu.matmul %69, %92, %cst_68 {dimension_numbers = #tpu.dot_dimension_numbers<[1], [0], [0], [1], [0, 0, 1, 1], [], []>} : vector<18x32xbf16>, vector<32x128xbf16>, vector<18x128xf32> -> vector<18x128xf32>
    %94 = vector.extract_strided_slice %93 {offsets = [4, 0], sizes = [8, 128], strides = [1, 1]} : vector<18x128xf32> to vector<8x128xf32>
    %95 = arith.addf %90, %94 : vector<8x128xf32>
    %c5_69 = arith.constant 5 : index
    %c0_70 = arith.constant 0 : index
    %c0_71 = arith.constant 0 : index
    %96 = vector.load %arg2[%c5_69, %c0_70, %c0_71] : memref<11x32x128xbf16, #tpu.memory_space<vmem>>, vector<1x32x128xbf16>
    %97 = vector.shape_cast %96 : vector<1x32x128xbf16> to vector<32x128xbf16>
    %cst_72 = arith.constant dense<0.000000e+00> : vector<18x128xf32>
    %98 = tpu.matmul %69, %97, %cst_72 {dimension_numbers = #tpu.dot_dimension_numbers<[1], [0], [0], [1], [0, 0, 1, 1], [], []>} : vector<18x32xbf16>, vector<32x128xbf16>, vector<18x128xf32> -> vector<18x128xf32>
    %99 = vector.extract_strided_slice %98 {offsets = [5, 0], sizes = [8, 128], strides = [1, 1]} : vector<18x128xf32> to vector<8x128xf32>
    %100 = arith.addf %95, %99 : vector<8x128xf32>
    %c6_73 = arith.constant 6 : index
    %c0_74 = arith.constant 0 : index
    %c0_75 = arith.constant 0 : index
    %101 = vector.load %arg2[%c6_73, %c0_74, %c0_75] : memref<11x32x128xbf16, #tpu.memory_space<vmem>>, vector<1x32x128xbf16>
    %102 = vector.shape_cast %101 : vector<1x32x128xbf16> to vector<32x128xbf16>
    %cst_76 = arith.constant dense<0.000000e+00> : vector<18x128xf32>
    %103 = tpu.matmul %69, %102, %cst_76 {dimension_numbers = #tpu.dot_dimension_numbers<[1], [0], [0], [1], [0, 0, 1, 1], [], []>} : vector<18x32xbf16>, vector<32x128xbf16>, vector<18x128xf32> -> vector<18x128xf32>
    %104 = vector.extract_strided_slice %103 {offsets = [6, 0], sizes = [8, 128], strides = [1, 1]} : vector<18x128xf32> to vector<8x128xf32>
    %105 = arith.addf %100, %104 : vector<8x128xf32>
    %c7_77 = arith.constant 7 : index
    %c0_78 = arith.constant 0 : index
    %c0_79 = arith.constant 0 : index
    %106 = vector.load %arg2[%c7_77, %c0_78, %c0_79] : memref<11x32x128xbf16, #tpu.memory_space<vmem>>, vector<1x32x128xbf16>
    %107 = vector.shape_cast %106 : vector<1x32x128xbf16> to vector<32x128xbf16>
    %cst_80 = arith.constant dense<0.000000e+00> : vector<18x128xf32>
    %108 = tpu.matmul %69, %107, %cst_80 {dimension_numbers = #tpu.dot_dimension_numbers<[1], [0], [0], [1], [0, 0, 1, 1], [], []>} : vector<18x32xbf16>, vector<32x128xbf16>, vector<18x128xf32> -> vector<18x128xf32>
    %109 = vector.extract_strided_slice %108 {offsets = [7, 0], sizes = [8, 128], strides = [1, 1]} : vector<18x128xf32> to vector<8x128xf32>
    %110 = arith.addf %105, %109 : vector<8x128xf32>
    %c8_81 = arith.constant 8 : index
    %c0_82 = arith.constant 0 : index
    %c0_83 = arith.constant 0 : index
    %111 = vector.load %arg2[%c8_81, %c0_82, %c0_83] : memref<11x32x128xbf16, #tpu.memory_space<vmem>>, vector<1x32x128xbf16>
    %112 = vector.shape_cast %111 : vector<1x32x128xbf16> to vector<32x128xbf16>
    %cst_84 = arith.constant dense<0.000000e+00> : vector<18x128xf32>
    %113 = tpu.matmul %69, %112, %cst_84 {dimension_numbers = #tpu.dot_dimension_numbers<[1], [0], [0], [1], [0, 0, 1, 1], [], []>} : vector<18x32xbf16>, vector<32x128xbf16>, vector<18x128xf32> -> vector<18x128xf32>
    %114 = vector.extract_strided_slice %113 {offsets = [8, 0], sizes = [8, 128], strides = [1, 1]} : vector<18x128xf32> to vector<8x128xf32>
    %115 = arith.addf %110, %114 : vector<8x128xf32>
    %c9_85 = arith.constant 9 : index
    %c0_86 = arith.constant 0 : index
    %c0_87 = arith.constant 0 : index
    %116 = vector.load %arg2[%c9_85, %c0_86, %c0_87] : memref<11x32x128xbf16, #tpu.memory_space<vmem>>, vector<1x32x128xbf16>
    %117 = vector.shape_cast %116 : vector<1x32x128xbf16> to vector<32x128xbf16>
    %cst_88 = arith.constant dense<0.000000e+00> : vector<18x128xf32>
    %118 = tpu.matmul %69, %117, %cst_88 {dimension_numbers = #tpu.dot_dimension_numbers<[1], [0], [0], [1], [0, 0, 1, 1], [], []>} : vector<18x32xbf16>, vector<32x128xbf16>, vector<18x128xf32> -> vector<18x128xf32>
    %119 = vector.extract_strided_slice %118 {offsets = [9, 0], sizes = [8, 128], strides = [1, 1]} : vector<18x128xf32> to vector<8x128xf32>
    %120 = arith.addf %115, %119 : vector<8x128xf32>
    %c10_89 = arith.constant 10 : index
    %c0_90 = arith.constant 0 : index
    %c0_91 = arith.constant 0 : index
    %121 = vector.load %arg2[%c10_89, %c0_90, %c0_91] : memref<11x32x128xbf16, #tpu.memory_space<vmem>>, vector<1x32x128xbf16>
    %122 = vector.shape_cast %121 : vector<1x32x128xbf16> to vector<32x128xbf16>
    %cst_92 = arith.constant dense<0.000000e+00> : vector<18x128xf32>
    %123 = tpu.matmul %69, %122, %cst_92 {dimension_numbers = #tpu.dot_dimension_numbers<[1], [0], [0], [1], [0, 0, 1, 1], [], []>} : vector<18x32xbf16>, vector<32x128xbf16>, vector<18x128xf32> -> vector<18x128xf32>
    %124 = vector.extract_strided_slice %123 {offsets = [10, 0], sizes = [8, 128], strides = [1, 1]} : vector<18x128xf32> to vector<8x128xf32>
    %125 = arith.addf %120, %124 : vector<8x128xf32>
    %c0_93 = arith.constant 0 : index
    %c0_94 = arith.constant 0 : index
    %126 = vector.load %arg3[%c0_93, %c0_94] : memref<1x128xf32, #tpu.memory_space<vmem>>, vector<1x128xf32>
    %127 = vector.broadcast %126 : vector<1x128xf32> to vector<8x128xf32>
    %128 = arith.addf %125, %127 : vector<8x128xf32>
    %cst_95 = arith.constant 0.000000e+00 : f32
    %129 = vector.broadcast %cst_95 : f32 to vector<8x128xf32>
    %130 = arith.maximumf %128, %129 : vector<8x128xf32>
    %cst_96 = arith.constant dense<0xFF800000> : vector<128xf32>
    %131 = vector.multi_reduction <maximumf>, %130, %cst_96 [0] : vector<8x128xf32> to vector<128xf32>
    %132 = vector.shape_cast %131 : vector<128xf32> to vector<1x128xf32>
    %c0_97 = arith.constant 0 : index
    %c1_98 = arith.constant 1 : index
    %c0_99 = arith.constant 0 : index
    %133 = vector.load %arg4[%c0_97, %c1_98, %c0_99] : memref<1x2x128xf32, #tpu.memory_space<vmem>>, vector<1x1x128xf32>
    %134 = vector.shape_cast %133 : vector<1x1x128xf32> to vector<1x128xf32>
    %135 = vector.shape_cast %132 : vector<1x128xf32> to vector<1x1x128xf32>
    tpu.vector_store %arg4[%c0_97, %c1_98, %c0_99], %135 {strides = array<i32>} : memref<1x2x128xf32, #tpu.memory_space<vmem>>, vector<1x1x128xf32>,
    return
  }
  func.func @transform_0(%arg0: i32) -> (i32, i32, i32, i32) {
    %c0_i32 = arith.constant 0 : i32
    %c0_i32_0 = arith.constant 0 : i32
    %c0_i32_1 = arith.constant 0 : i32
    %c0_i32_2 = arith.constant 0 : i32
    return %arg0, %c0_i32, %c0_i32_0, %c0_i32_1 : i32, i32, i32, i32
  }
  func.func @transform_1(%arg0: i32) -> (i32, i32, i32) {
    %c0_i32 = arith.constant 0 : i32
    %c0_i32_0 = arith.constant 0 : i32
    %c0_i32_1 = arith.constant 0 : i32
    %c0_i32_2 = arith.constant 0 : i32
    return %c0_i32, %c0_i32_0, %c0_i32_1 : i32, i32, i32
  }
  func.func @transform_2(%arg0: i32) -> (i32, i32) {
    %c0_i32 = arith.constant 0 : i32
    %c0_i32_0 = arith.constant 0 : i32
    %c0_i32_1 = arith.constant 0 : i32
    return %c0_i32, %c0_i32_0 : i32, i32
  }
  func.func @transform_3(%arg0: i32) -> (i32, i32, i32) {
    %c0_i32 = arith.constant 0 : i32
    %c0_i32_0 = arith.constant 0 : i32
    %c0_i32_1 = arith.constant 0 : i32
    return %arg0, %c0_i32, %c0_i32_0 : i32, i32, i32
  }
}

</mosaic_0001>

<bundles_post_ra>
// kernel: tpu_custom_call.1
= control target key start
LH: loop header
LB: loop body
LE: loop exit
PB: predicated region body
PF: predicated region fallthrough
CT: control target
= control target key end

     0   :  { %8 = vsyncpa [#allocation3], 0  ;;  %s2698_s0 = inlined_call_operand.vmem [shape: bf16[2,2,18,32], index: 0, kind: input, shape index: {}]   ;;  %s2699_s1 = inlined_call_operand.hbm [shape: bf16[11,32,128], index: 1, kind: input, shape index: {}]   ;;  %s2700_s2 = inlined_call_operand.vmem [shape: f32[1,128], index: 2, kind: input, shape index: {}]   ;;  %s2701_s3 = inlined_call_operand.hbm [shape: f32[2,2,128], index: 3, kind: output, shape index: {}]  }
   0x1   :  { %9 = vsyncpa [#allocation4], 0 }
   0x2   :  { %11 = vsyncpa [#allocation4 + $0x1], 0  ;;  %s2457_s12 = smov 0   ;;  %s2459_s13 = smov 0  }
   0x3   :  { %s2461_s14 = smov 0   ;;  %s2463_s15 = smov 0  }
   0x4 LB: > { %s2478_s16 = sadd.s32 4294967295, %s2431_s15   ;;  %s1867_s17 = sadd.s32 4294967294, %s2431_s15   ;;  %s2431_s15 = sphi %s2463_s15, %s2709_s15   ;;  %s2427_s14 = sphi %s2461_s14, %s2708_s14   ;;  %s2423_s13 = sphi %s2459_s13, %s2707_s13   ;;  %s2419_s12 = sphi %s2457_s12, %s2706_s12  }
   0x5   : > { %s2482_s18 = sadd.s32 1, %s2431_s15   ;;  %s92_s19 = sadd.s32 1, %s2427_s14 }
   0x6   : > { %s89_s20 = ssub.s32 %s2431_s15, %s2482_s18  ;;  %p102_p0 = scmp.ne.s32.totalorder %s2427_s14, %s2423_s13 }
   0x7   : > { %p90_p1 = scmp.eq.s32.totalorder %s89_s20, 0  ;;  %p103_p2 = scmp.eq.s32.totalorder %s2478_s16, 1 }
   0x8   : > { %p108_p3 = scmp.ne.s32.totalorder %s2423_s13, %s2419_s12  ;;  %p109_p4 = scmp.eq.s32.totalorder %s1867_s17, 1 }
   0x9   : > { %s2493_s21 = scalar_select %p90_p1, %s2427_s14, %s92_s19  }
   0xa   : > { %p2495_p5 = por %p103_p2, %p102_p0  ;;  %p2499_p6 = por %p109_p4, %p108_p3 }
   0xb   : > { %p1868_p7 = scmp.ge.s32.totalorder %s2431_s15, 1  ;;  %p116_p8 = scmp.lt.s32.totalorder %s2431_s15, 3 }
   0xc   : > { %s2703_s23 = scalar_select %p2499_p6, 1, 0 }
   0xd   : > { %p2255_p9 = scmp.eq.s32.totalorder %s2478_s16, 0  ;;  %p2506_p10 = pnand %p1868_p7, %p116_p8 }
   0xe   : > { %s2433_s25 = smov [#allocation2]  }
   0xf   : > { %s128_s26 = sshll.u32 %s2433_s25, 4  ;;  %p2247_p11 = pneg %p2506_p10  ;;  %s129_s26 = int_to_ptr.vmem [resolvable:$true] %s128_s26 }
  0x10   : > { %s2352_s27 = scalar_lea.vmem %s129_s26, 2816  ;;  %p2360_p3 = scmp.lt.s32.totalorder %s129_s26, %s129_s26 }
  0x11   : > { %p2248_p12 = pnand %p2255_p9, %p2247_p11  ;;  %p2353_p0 = scmp.ne.s32.totalorder %s129_s26, %s2352_s27 }
  0x12   : > { %p2361_p4 = scmp.lt.s32.totalorder %s2352_s27, %s2352_s27 }
  0x13   : > { %p2343_p13 = pneg %p2248_p12 }
  0x14   : > { %p2362_p6 = por %p2361_p4, %p2360_p3 }
  0x15   : > { %p2355_p1 = pnand %p2353_p0, %p2343_p13 }
  0x17   : > { %p2356_p2 = pneg %p2355_p1 }
  0x19   : > { %p2363_p7 = pnand %p2362_p6, %p2356_p2 }
  0x1b   : > { %2366 = shalt.err (!%p2363_p7)
}
  0x1c   : > { %s2434_s28 = smov 64   ;;  %s2435_s29 = smov 4  }
  0x1d   : > { %2250 = dma.hbm_to_vmem [thread:$0]  (!%p2248_p12), %s2699_s1, 2816, %s129_s26, [#allocation3], %s2434_s28, %s2434_s28, %s2435_s29  }
  0x1e   : > { %155 = sbr.rel (%p2506_p10) target bundleno = 360 (0x168), region = 32 }
  0x23   : > { %2410 = dma.done.wait (%p2255_p9), [#allocation3], 2816  }
  0x24   : > { %2412 = vsyncadd (%p2255_p9), [#allocation3], 4294964480  ;;  %p179_p8 = scmp.lt.s32.totalorder %s2478_s16, 1  ;;  %v2293_v0 = vld [vmem:[#allocation2 + $0x8] sm:$0xff]   ;;  %v2294_v1 = vld [vmem:[#allocation2 + $0x18] sm:$0xff]   ;;  %vm212_vm0 = vcmask 261120  }
  0x25   : > { %2064 = vmatprep.subr.bf16.mxu0 %v2293_v0  ;;  %v2295_v2 = vld [vmem:[#allocation2] sm:$0xff]   ;;  %2072 = vmatprep.subr.bf16.mxu1 %v2294_v1  ;;  %v2296_v3 = vld [vmem:[#allocation2 + $0x10] sm:$0xff]   ;;  %v2299_v6 = vld [vmem:[#allocation2 + $0x28] sm:$0xff]   ;;  %vm332_vm1 = vcmask 1046528   ;;  %vm404_vm2 = vcmask 1045504   ;;  %vm476_vm3 = vcmask 1044480  }
  0x26   : > { %s180_s5 = scalar_select %p179_p8, %s2478_s16, 1  ;;  %2065 = vmatpush3.bf16.msra.mxu0 %v2293_v0  ;;  %2073 = vmatpush3.bf16.msra.mxu1 %v2294_v1  ;;  %v2300_v7 = vld [vmem:[#allocation2 + $0x38] sm:$0xff]   ;;  %v2301_v8 = vld [vmem:[#allocation2 + $0x20] sm:$0xff]   ;;  %v2302_v9 = vld [vmem:[#allocation2 + $0x30] sm:$0xff]   ;;  %vm548_vm4 = vcmask 1043456   ;;  %vm620_vm5 = vcmask 1042432  }
  0x27   : > { %2066 = vmatprep.subr.bf16.mxu0 %v2295_v2  ;;  %2074 = vmatprep.subr.bf16.mxu1 %v2296_v3  ;;  %v2303_v10 = vld [vmem:[#allocation2 + $0x48] sm:$0xff]   ;;  %v2304_v11 = vld [vmem:[#allocation2 + $0x58] sm:$0xff]   ;;  %v2305_v12 = vld [vmem:[#allocation2 + $0x40] sm:$0xff]   ;;  %vm692_vm6 = vcmask 1041408   ;;  %vm764_vm7 = vcmask 1040384   ;;  %s176_s17 = sand.u32 1, %s2423_s13  }
  0x28   : > { %s2240_s6 = smul.u32 24, %s180_s5  ;;  %v2306_v13 = vld [vmem:[#allocation2 + $0x50] sm:$0xff]   ;;  %v2307_v14 = vld [vmem:[#allocation2 + $0x68] sm:$0xff]   ;;  %v2308_v15 = vld [vmem:[#allocation2 + $0x78] sm:$0xff]   ;;  %s1873_s19 = sshll.u32 %s176_s17, 1 }
  0x29   : > { %v2309_v16 = vld [vmem:[#allocation2 + $0x60] sm:$0xff]   ;;  %v2310_v17 = vld [vmem:[#allocation2 + $0x70] sm:$0xff]   ;;  %v2311_v18 = vld [vmem:[#allocation2 + $0x88] sm:$0xff]   ;;  %s2649_s20 = scalar_lea.vmem [#allocation5], %s1873_s19  ;;  %s1973_s24 = sshll.u32 %s2478_s16, 5 }
  0x2a   : > { %s2528_s9 = scalar_lea.vmem %s2698_s0, %s2240_s6  ;;  %2067 = vmatpush3.bf16.msra.mxu0 %v2295_v2  ;;  %2075 = vmatpush3.bf16.msra.mxu1 %v2296_v3  ;;  %v2312_v19 = vld [vmem:[#allocation2 + $0x98] sm:$0xff]   ;;  %v2313_v20 = vld [vmem:[#allocation2 + $0x80] sm:$0xff]   ;;  %v2314_v21 = vld [vmem:[#allocation2 + $0x90] sm:$0xff]   ;;  %s1796_s25 = sshll.u32 %s2649_s20, 4  ;;  %s1797_s25 = int_to_ptr.vmem [resolvable:$true] %s1796_s25 }
  0x2b   : > { %v2531_v4 = vld [vmem:[%s2528_s9] sm:$0xff]   ;;  %v2534_v5 = vld [vmem:[%s2528_s9 + $0x8] ss:$0 sps:$4 sm:$0x11]   ;;  %2080 = vmatprep.subr.bf16.mxu0 %v2299_v6  ;;  %2088 = vmatprep.subr.bf16.mxu1 %v2300_v7  ;;  %v2575_v26 = vld [vmem:[%s2528_s9 + $0xc] sm:$0xff]   ;;  %s1794_s28 = scalar_lea.hbm %s2701_s3, %s1973_s24  ;;  %s1783_s29 = scalar_lea.sflag [#allocation4], %s176_s17 }
  0x2c   : > { %2068 = vmatprep.mubr.msk.bf16.mxu0 %vm212_vm0, %v2531_v4  ;;  %2076 = vmatprep.mubr.msk.bf16.mxu1 %vm212_vm0, %v2531_v4  ;;  %v2315_v22 = vld [vmem:[#allocation2 + $0xa8] sm:$0xff]   ;;  %v2317_v24 = vld [vmem:[#allocation2 + $0xa0] sm:$0xff]   ;;  %v2321_v27 = vld [vmem:[#allocation2 + $0x18] sm:$0xff]   ;;  %s2367_s30 = scalar_lea.vmem %s1797_s25, 32  ;;  %s2436_s4 = smov [#allocation5]  }
  0x2d   : > { %2069 = vmatmul.mubr.msk.bf16.vlgmr.msra.gmra.mxu0 %vm212_vm0, %v2534_v5  ;;  %2077 = vmatmul.mubr.msk.bf16.vlgmr.msra.gmra.mxu1 %vm212_vm0, %v2534_v5  ;;  %v2316_v23 = vld [vmem:[#allocation2 + $0x8] sm:$0xff]   ;;  %v2318_v25 = vld [vmem:[#allocation2] sm:$0xff]   ;;  %v2584_v29 = vld [vmem:[%s2528_s9 + $0x14] ss:$0 sps:$4 sm:$0x11]   ;;  %p2368_p6 = scmp.ne.s32.totalorder %s1797_s25, %s2367_s30  ;;  %s2371_s5 = sshll.u32 %s2436_s4, 4  ;;  %s2372_s5 = int_to_ptr.vmem [resolvable:$false] %s2371_s5 }
  0x2e   : > { %2081 = vmatpush3.bf16.msra.mxu0 %v2299_v6  ;;  %2089 = vmatpush3.bf16.msra.mxu1 %v2300_v7  ;;  %v2322_v28 = vld [vmem:[#allocation2 + $0x28] sm:$0xff]   ;;  %v2323_v30 = vld [vmem:[#allocation2 + $0x10] sm:$0xff]   ;;  %v2324_v31 = vld [vmem:[#allocation2 + $0x20] sm:$0xff]   ;;  %s2373_s16 = scalar_lea.vmem %s2372_s5, 64  ;;  %p2374_p11 = scmp.lt.s32.totalorder %s1797_s25, %s2372_s5 }
  0x2f   : > { %2082 = vmatprep.subr.bf16.mxu0 %v2301_v8  ;;  %2090 = vmatprep.subr.bf16.mxu1 %v2302_v9  ;;  %v2325_v32 = vld [vmem:[#allocation2 + $0x38] sm:$0xff]   ;;  %v2326_v33 = vld [vmem:[#allocation2 + $0x48] sm:$0xff]   ;;  %v2327_v34 = vld [vmem:[#allocation2 + $0x30] sm:$0xff]   ;;  %p2369_p9 = pnand %p2368_p6, %p2495_p5  ;;  %p2375_p12 = scmp.lt.s32.totalorder %s2373_s16, %s2367_s30 }
  0x30   : > { %2084 = vmatprep.mubr.msk.bf16.mxu0 %vm212_vm0, %v2531_v4  ;;  %2092 = vmatprep.mubr.msk.bf16.mxu1 %vm212_vm0, %v2531_v4  ;;  %v2328_v35 = vld [vmem:[#allocation2 + $0x40] sm:$0xff]   ;;  %v2329_v36 = vld [vmem:[#allocation2 + $0x58] sm:$0xff]   ;;  %v2330_v37 = vld [vmem:[#allocation2 + $0x68] sm:$0xff]  }
  0x31   : > { %v2331_v38 = vld [vmem:[#allocation2 + $0x50] sm:$0xff]   ;;  %v2332_v39 = vld [vmem:[#allocation2 + $0x60] sm:$0xff]   ;;  %v2333_v40 = vld [vmem:[#allocation2 + $0x78] sm:$0xff]   ;;  %p2370_p10 = pneg %p2369_p9  ;;  %p2376_p13 = por %p2375_p12, %p2374_p11 }
  0x32   : > { %2083 = vmatpush3.bf16.msra.mxu0 %v2301_v8  ;;  %2091 = vmatpush3.bf16.msra.mxu1 %v2302_v9  ;;  %v2334_v41 = vld [vmem:[#allocation2 + $0x88] sm:$0xff]   ;;  %v2335_v42 = vld [vmem:[#allocation2 + $0x70] sm:$0xff]   ;;  %v2336_v43 = vld [vmem:[#allocation2 + $0x80] sm:$0xff]  }
  0x33   : > { %2096 = vmatprep.subr.bf16.mxu0 %v2303_v10  ;;  %2104 = vmatprep.subr.bf16.mxu1 %v2304_v11  ;;  %v2337_v44 = vld [vmem:[#allocation2 + $0x98] sm:$0xff]   ;;  %v2338_v45 = vld [vmem:[#allocation2 + $0xa8] sm:$0xff]   ;;  %v2339_v46 = vld [vmem:[#allocation2 + $0x90] sm:$0xff]   ;;  %p2377_p0 = pnand %p2376_p13, %p2370_p10 }
  0x34   : > { %v2340_v47 = vld [vmem:[#allocation2 + $0xa0] sm:$0xff]  }
  0x35   : > { %2085 = vmatmul.mubr.msk.bf16.vlgmr.msra.gmra.mxu0 %vm212_vm0, %v2534_v5  ;;  %2093 = vmatmul.mubr.msk.bf16.vlgmr.msra.gmra.mxu1 %vm212_vm0, %v2534_v5 }
  0x36   : > { %2097 = vmatpush3.bf16.msra.mxu0 %v2303_v10  ;;  %2105 = vmatpush3.bf16.msra.mxu1 %v2304_v11 }
  0x37   : > { %2098 = vmatprep.subr.bf16.mxu0 %v2305_v12  ;;  %2106 = vmatprep.subr.bf16.mxu1 %v2306_v13 }
  0x38   : > { %2100 = vmatprep.mubr.msk.bf16.mxu0 %vm212_vm0, %v2531_v4  ;;  %2108 = vmatprep.mubr.msk.bf16.mxu1 %vm212_vm0, %v2531_v4 }
  0x3a   : > { %2099 = vmatpush3.bf16.msra.mxu0 %v2305_v12  ;;  %2107 = vmatpush3.bf16.msra.mxu1 %v2306_v13 }
  0x3b   : > { %2112 = vmatprep.subr.bf16.mxu0 %v2307_v14  ;;  %2120 = vmatprep.subr.bf16.mxu1 %v2308_v15 }
  0x3d   : > { %2101 = vmatmul.mubr.msk.bf16.vlgmr.msra.gmra.mxu0 %vm212_vm0, %v2534_v5  ;;  %2109 = vmatmul.mubr.msk.bf16.vlgmr.msra.gmra.mxu1 %vm212_vm0, %v2534_v5 }
  0x3e   : > { %2113 = vmatpush3.bf16.msra.mxu0 %v2307_v14  ;;  %2121 = vmatpush3.bf16.msra.mxu1 %v2308_v15 }
  0x3f   : > { %2114 = vmatprep.subr.bf16.mxu0 %v2309_v16  ;;  %2122 = vmatprep.subr.bf16.mxu1 %v2310_v17 }
  0x40   : > { %2116 = vmatprep.mubr.msk.bf16.mxu0 %vm212_vm0, %v2531_v4  ;;  %2124 = vmatprep.mubr.msk.bf16.mxu1 %vm212_vm0, %v2531_v4 }
  0x42   : > { %2115 = vmatpush3.bf16.msra.mxu0 %v2309_v16  ;;  %2123 = vmatpush3.bf16.msra.mxu1 %v2310_v17 }
  0x43   : > { %2128 = vmatprep.subr.bf16.mxu0 %v2311_v18  ;;  %2136 = vmatprep.subr.bf16.mxu1 %v2312_v19 }
  0x45   : > { %2117 = vmatmul.mubr.msk.bf16.vlgmr.msra.gmra.mxu0 %vm212_vm0, %v2534_v5  ;;  %2125 = vmatmul.mubr.msk.bf16.vlgmr.msra.gmra.mxu1 %vm212_vm0, %v2534_v5 }
  0x46   : > { %2129 = vmatpush3.bf16.msra.mxu0 %v2311_v18  ;;  %2137 = vmatpush3.bf16.msra.mxu1 %v2312_v19 }
  0x47   : > { %2130 = vmatprep.subr.bf16.mxu0 %v2313_v20  ;;  %2138 = vmatprep.subr.bf16.mxu1 %v2314_v21 }
  0x48   : > { %2132 = vmatprep.mubr.msk.bf16.mxu0 %vm212_vm0, %v2531_v4  ;;  %2140 = vmatprep.mubr.msk.bf16.mxu1 %vm212_vm0, %v2531_v4 }
  0x4a   : > { %2131 = vmatpush3.bf16.msra.mxu0 %v2313_v20  ;;  %2139 = vmatpush3.bf16.msra.mxu1 %v2314_v21 }
  0x4b   : > { %2144 = vmatprep.subr.bf16.mxu0 %v2315_v22  ;;  %2152 = vmatprep.subr.bf16.mxu1 %v2316_v23 }
  0x4d   : > { %2133 = vmatmul.mubr.msk.bf16.vlgmr.msra.gmra.mxu0 %vm212_vm0, %v2534_v5  ;;  %2141 = vmatmul.mubr.msk.bf16.vlgmr.msra.gmra.mxu1 %vm212_vm0, %v2534_v5 }
  0x4e   : > { %2145 = vmatpush3.bf16.msra.mxu0 %v2315_v22  ;;  %2153 = vmatpush3.bf16.msra.mxu1 %v2316_v23 }
  0x4f   : > { %2146 = vmatprep.subr.bf16.mxu0 %v2317_v24  ;;  %2154 = vmatprep.subr.bf16.mxu1 %v2318_v25 }
  0x50   : > { %2148 = vmatprep.mubr.msk.bf16.mxu0 %vm212_vm0, %v2531_v4  ;;  %2156 = vmatprep.mubr.msk.bf16.mxu1 %vm212_vm0, %v2575_v26 }
  0x52   : > { %2147 = vmatpush3.bf16.msra.mxu0 %v2317_v24  ;;  %2155 = vmatpush3.bf16.msra.mxu1 %v2318_v25 }
  0x53   : > { %2160 = vmatprep.subr.bf16.mxu0 %v2321_v27  ;;  %2168 = vmatprep.subr.bf16.mxu1 %v2322_v28 }
  0x55   : > { %2149 = vmatmul.mubr.msk.bf16.vlgmr.msra.gmra.mxu0 %vm212_vm0, %v2534_v5  ;;  %2157 = vmatmul.mubr.msk.bf16.vlgmr.msra.gmra.mxu1 %vm212_vm0, %v2584_v29 }
  0x56   : > { %2161 = vmatpush3.bf16.msra.mxu0 %v2321_v27  ;;  %2169 = vmatpush3.bf16.msra.mxu1 %v2322_v28 }
  0x57   : > { %2162 = vmatprep.subr.bf16.mxu0 %v2323_v30  ;;  %2170 = vmatprep.subr.bf16.mxu1 %v2324_v31 }
  0x58   : > { %2164 = vmatprep.mubr.msk.bf16.mxu0 %vm212_vm0, %v2575_v26  ;;  %2172 = vmatprep.mubr.msk.bf16.mxu1 %vm212_vm0, %v2575_v26 }
  0x5a   : > { %2163 = vmatpush3.bf16.msra.mxu0 %v2323_v30  ;;  %2171 = vmatpush3.bf16.msra.mxu1 %v2324_v31 }
  0x5b   : > { %2176 = vmatprep.subr.bf16.mxu0 %v2325_v32  ;;  %2184 = vmatprep.subr.bf16.mxu1 %v2326_v33 }
  0x5d   : > { %2165 = vmatmul.mubr.msk.bf16.vlgmr.msra.gmra.mxu0 %vm212_vm0, %v2584_v29  ;;  %2173 = vmatmul.mubr.msk.bf16.vlgmr.msra.gmra.mxu1 %vm212_vm0, %v2584_v29 }
  0x5e   : > { %2177 = vmatpush3.bf16.msra.mxu0 %v2325_v32  ;;  %2185 = vmatpush3.bf16.msra.mxu1 %v2326_v33 }
  0x5f   : > { %2178 = vmatprep.subr.bf16.mxu0 %v2327_v34  ;;  %2186 = vmatprep.subr.bf16.mxu1 %v2328_v35 }
  0x60   : > { %2180 = vmatprep.mubr.msk.bf16.mxu0 %vm212_vm0, %v2575_v26  ;;  %2188 = vmatprep.mubr.msk.bf16.mxu1 %vm212_vm0, %v2575_v26 }
  0x62   : > { %2179 = vmatpush3.bf16.msra.mxu0 %v2327_v34  ;;  %2187 = vmatpush3.bf16.msra.mxu1 %v2328_v35 }
  0x63   : > { %2192 = vmatprep.subr.bf16.mxu0 %v2329_v36  ;;  %2200 = vmatprep.subr.bf16.mxu1 %v2330_v37 }
  0x65   : > { %2181 = vmatmul.mubr.msk.bf16.vlgmr.msra.gmra.mxu0 %vm212_vm0, %v2584_v29  ;;  %2189 = vmatmul.mubr.msk.bf16.vlgmr.msra.gmra.mxu1 %vm212_vm0, %v2584_v29 }
  0x66   : > { %2193 = vmatpush3.bf16.msra.mxu0 %v2329_v36  ;;  %2201 = vmatpush3.bf16.msra.mxu1 %v2330_v37 }
  0x67   : > { %2194 = vmatprep.subr.bf16.mxu0 %v2331_v38  ;;  %2202 = vmatprep.subr.bf16.mxu1 %v2332_v39 }
  0x68   : > { %2196 = vmatprep.mubr.msk.bf16.mxu0 %vm212_vm0, %v2575_v26  ;;  %2204 = vmatprep.mubr.msk.bf16.mxu1 %vm212_vm0, %v2575_v26 }
  0x6a   : > { %2195 = vmatpush3.bf16.msra.mxu0 %v2331_v38  ;;  %2203 = vmatpush3.bf16.msra.mxu1 %v2332_v39 }
  0x6b   : > { %2208 = vmatprep.subr.bf16.mxu0 %v2333_v40  ;;  %2216 = vmatprep.subr.bf16.mxu1 %v2334_v41 }
  0x6d   : > { %2197 = vmatmul.mubr.msk.bf16.vlgmr.msra.gmra.mxu0 %vm212_vm0, %v2584_v29  ;;  %2205 = vmatmul.mubr.msk.bf16.vlgmr.msra.gmra.mxu1 %vm212_vm0, %v2584_v29 }
  0x6e   : > { %2209 = vmatpush3.bf16.msra.mxu0 %v2333_v40  ;;  %2217 = vmatpush3.bf16.msra.mxu1 %v2334_v41 }
  0x6f   : > { %2210 = vmatprep.subr.bf16.mxu0 %v2335_v42  ;;  %2218 = vmatprep.subr.bf16.mxu1 %v2336_v43 }
  0x70   : > { %2212 = vmatprep.mubr.msk.bf16.mxu0 %vm212_vm0, %v2575_v26  ;;  %2220 = vmatprep.mubr.msk.bf16.mxu1 %vm212_vm0, %v2575_v26 }
  0x72   : > { %2211 = vmatpush3.bf16.msra.mxu0 %v2335_v42  ;;  %2219 = vmatpush3.bf16.msra.mxu1 %v2336_v43 }
  0x73   : > { %2224 = vmatprep.subr.bf16.mxu0 %v2337_v44  ;;  %2232 = vmatprep.subr.bf16.mxu1 %v2338_v45 }
  0x75   : > { %2213 = vmatmul.mubr.msk.bf16.vlgmr.msra.gmra.mxu0 %vm212_vm0, %v2584_v29  ;;  %2221 = vmatmul.mubr.msk.bf16.vlgmr.msra.gmra.mxu1 %vm212_vm0, %v2584_v29 }
  0x76   : > { %2225 = vmatpush3.bf16.msra.mxu0 %v2337_v44  ;;  %2233 = vmatpush3.bf16.msra.mxu1 %v2338_v45 }
  0x77   : > { %2226 = vmatprep.subr.bf16.mxu0 %v2339_v46  ;;  %2234 = vmatprep.subr.bf16.mxu1 %v2340_v47 }
  0x78   : > { %2228 = vmatprep.mubr.msk.bf16.mxu0 %vm212_vm0, %v2575_v26  ;;  %2236 = vmatprep.mubr.msk.bf16.mxu1 %vm212_vm0, %v2575_v26 }
  0x7a   : > { %2227 = vmatpush3.bf16.msra.mxu0 %v2339_v46  ;;  %2235 = vmatpush3.bf16.msra.mxu1 %v2340_v47 }
  0x7d   : > { %2229 = vmatmul.mubr.msk.bf16.vlgmr.msra.gmra.mxu0 %vm212_vm0, %v2584_v29  ;;  %2237 = vmatmul.mubr.msk.bf16.vlgmr.msra.gmra.mxu1 %vm212_vm0, %v2584_v29 }
  0xed   : > { %v2070_v48 = vpop.f32.mrf.mxu0  ;;  %v2078_v49 = vpop.f32.mrf.mxu1 }
  0xef   : > { %v253_v50 = vpop.f32.mrf.mxu0  ;;  %v317_v51 = vpop.f32.mrf.mxu1 }
  0xf0   : > { %v333_v2 = vrot.slane %v317_v51, 1 }
  0xf1   : > { %v2071_v52 = vpop.f32.mrf.mxu0  ;;  %v2079_v53 = vpop.f32.mrf.mxu1 }
  0xf3   : > { %v256_v54 = vpop.f32.mrf.mxu0  ;;  %v320_v55 = vpop.f32.mrf.mxu1 }
  0xf4   : > { %v334_v63 = vrot.slane %v320_v55, 1 }
  0xf5   : > { %v2086_v56 = vpop.f32.mrf.mxu0  ;;  %v2094_v57 = vpop.f32.mrf.mxu1 }
  0xf6   : > { %v335_v6 = vsel %vm332_vm1, %v333_v2, %v334_v63 }
  0xf7   : > { %v389_v58 = vpop.f32.mrf.mxu0  ;;  %v461_v59 = vpop.f32.mrf.mxu1  ;;  %v337_v12 = vadd.f32 %v335_v6, %v253_v50 }
  0xf8   : > { %v405_v7 = vrot.slane %v389_v58, 2  ;;  %v477_v19 = vrot.slane %v461_v59, 3 }
  0xf9   : > { %v2087_v60 = vpop.f32.mrf.mxu0  ;;  %v2095_v61 = vpop.f32.mrf.mxu1 }
  0xfb   : > { %v392_v62 = vpop.f32.mrf.mxu0  ;;  %v464_v0 = vpop.f32.mrf.mxu1 }
  0xfc   : > { %v406_v3 = vrot.slane %v392_v62, 2  ;;  %v478_v14 = vrot.slane %v464_v0, 3 }
  0xfd   : > { %v2102_v1 = vpop.f32.mrf.mxu0  ;;  %v2110_v4 = vpop.f32.mrf.mxu1 }
  0xfe   : > { %v407_v10 = vsel %vm404_vm2, %v405_v7, %v406_v3  ;;  %v479_v23 = vsel %vm476_vm3, %v477_v19, %v478_v14 }
  0xff   : > { %v533_v5 = vpop.f32.mrf.mxu0  ;;  %v605_v8 = vpop.f32.mrf.mxu1  ;;  %v409_v17 = vadd.f32 %v407_v10, %v337_v12 }
 0x100   : > { %v549_v20 = vrot.slane %v533_v5, 4  ;;  %v621_v32 = vrot.slane %v605_v8, 5  ;;  %v2642_v5 = vld [vmem:[%s2700_s2] ss:$0 sm:$0xff] }
 0x101   : > { %v2103_v9 = vpop.f32.mrf.mxu0  ;;  %v2111_v11 = vpop.f32.mrf.mxu1  ;;  %v481_v26 = vadd.f32 %v479_v23, %v409_v17 }
 0x103   : > { %v536_v13 = vpop.f32.mrf.mxu0  ;;  %v608_v16 = vpop.f32.mrf.mxu1 }
 0x104   : > { %v550_v15 = vrot.slane %v536_v13, 4  ;;  %v622_v28 = vrot.slane %v608_v16, 5 }
 0x105   : > { %v2118_v18 = vpop.f32.mrf.mxu0  ;;  %v2126_v21 = vpop.f32.mrf.mxu1 }
 0x106   : > { %v551_v24 = vsel %vm548_vm4, %v549_v20, %v550_v15  ;;  %v623_v37 = vsel %vm620_vm5, %v621_v32, %v622_v28 }
 0x107   : > { %v677_v22 = vpop.f32.mrf.mxu0  ;;  %v749_v25 = vpop.f32.mrf.mxu1  ;;  %v553_v30 = vadd.f32 %v551_v24, %v481_v26 }
 0x108   : > { %v693_v33 = vrot.slane %v677_v22, 6  ;;  %v765_v46 = vrot.slane %v749_v25, 7 }
 0x109   : > { %v2119_v27 = vpop.f32.mrf.mxu0  ;;  %v2127_v29 = vpop.f32.mrf.mxu1  ;;  %v625_v40 = vadd.f32 %v623_v37, %v553_v30 }
 0x10b   : > { %v680_v31 = vpop.f32.mrf.mxu0  ;;  %v752_v35 = vpop.f32.mrf.mxu1 }
 0x10c   : > { %v694_v34 = vrot.slane %v680_v31, 6  ;;  %v766_v42 = vrot.slane %v752_v35, 7 }
 0x10d   : > { %v2134_v36 = vpop.f32.mrf.mxu0  ;;  %v2142_v39 = vpop.f32.mrf.mxu1 }
 0x10e   : > { %v695_v38 = vsel %vm692_vm6, %v693_v33, %v694_v34  ;;  %v767_v49 = vsel %vm764_vm7, %v765_v46, %v766_v42  ;;  %v901_v56 = vrot.slane %v2142_v39, 1 }
 0x10f   : > { %v821_v41 = vpop.f32.mrf.mxu0  ;;  %v885_v43 = vpop.f32.mrf.mxu1  ;;  %v697_v45 = vadd.f32 %v695_v38, %v625_v40 }
 0x111   : > { %v2135_v44 = vpop.f32.mrf.mxu0  ;;  %v2143_v47 = vpop.f32.mrf.mxu1  ;;  %v769_v51 = vadd.f32 %v767_v49, %v697_v45 }
 0x113   : > { %v823_v48 = vpop.f32.mrf.mxu0  ;;  %v887_v50 = vpop.f32.mrf.mxu1 }
 0x114   : > { %v900_v53 = vrot.slane %v887_v50, 1  ;;  %v833_v58 = vadd.f32 %v823_v48, %v769_v51 }
 0x115   : > { %v2150_v52 = vpop.f32.mrf.mxu0  ;;  %v2158_v54 = vpop.f32.mrf.mxu1 }
 0x116   : > { %v902_v60 = vsel %vm332_vm1, %v900_v53, %v901_v56  ;;  %v972_v63 = vrot.slane %v2150_v52, 2 }
 0x117   : > { %v956_v55 = vpop.f32.mrf.mxu0  ;;  %v1060_v57 = vpop.f32.mrf.mxu1  ;;  %v904_v2 = vadd.f32 %v902_v60, %v833_v58 }
 0x119   : > { %v2151_v59 = vpop.f32.mrf.mxu0  ;;  %v2159_v61 = vpop.f32.mrf.mxu1 }
 0x11b   : > { %v958_v62 = vpop.f32.mrf.mxu0  ;;  %v1063_v1 = vpop.f32.mrf.mxu1 }
 0x11c   : > { %v971_v0 = vrot.slane %v958_v62, 2 }
 0x11d   : > { %v2166_v3 = vpop.f32.mrf.mxu0  ;;  %v2174_v6 = vpop.f32.mrf.mxu1 }
 0x11e   : > { %v973_v4 = vsel %vm404_vm2, %v971_v0, %v972_v63 }
 0x11f   : > { %v975_v7 = vadd.f32 %v973_v4, %v904_v2  ;;  %v1123_v8 = vpop.f32.mrf.mxu0  ;;  %v1193_v9 = vpop.f32.mrf.mxu1 }
 0x120   : > { %v1138_v25 = vrot.slane %v1123_v8, 1  ;;  %v1208_v39 = vrot.slane %v1193_v9, 2 }
 0x121   : > { %v983_v10 = vadd.f32 %v2642_v5, %v975_v7  ;;  %v2167_v11 = vpop.f32.mrf.mxu0  ;;  %v2175_v12 = vpop.f32.mrf.mxu1 }
 0x123   : > { %v984_v13 = vmax.f32 %v983_v10, 0.0  ;;  %v1126_v14 = vpop.f32.mrf.mxu0  ;;  %v1196_v15 = vpop.f32.mrf.mxu1 }
 0x124   : > { %v1139_v21 = vrot.slane %v1126_v14, 1  ;;  %v1209_v33 = vrot.slane %v1196_v15, 2 }
 0x125   : > { %v985_v16 = vrot.slane %v984_v13, 4  ;;  %v2182_v17 = vpop.f32.mrf.mxu0  ;;  %v2190_v18 = vpop.f32.mrf.mxu1 }
 0x126   : > { %v1140_v29 = vsel %vm332_vm1, %v1138_v25, %v1139_v21  ;;  %v1210_v43 = vsel %vm404_vm2, %v1208_v39, %v1209_v33 }
 0x127   : > { %v986_v19 = vmax.f32 %v984_v13, %v985_v16  ;;  %v1263_v20 = vpop.f32.mrf.mxu0  ;;  %v1333_v22 = vpop.f32.mrf.mxu1  ;;  %v1142_v36 = vadd.f32 %v1140_v29, %v1060_v57 }
 0x128   : > { %v1278_v40 = vrot.slane %v1263_v20, 3  ;;  %v1348_v53 = vrot.slane %v1333_v22, 4 }
 0x129   : > { %v987_v23 = vrot.slane %v986_v19, 2  ;;  %v2183_v24 = vpop.f32.mrf.mxu0  ;;  %v2191_v26 = vpop.f32.mrf.mxu1  ;;  %v1212_v46 = vadd.f32 %v1210_v43, %v1142_v36 }
 0x12b   : > { %v988_v27 = vmax.f32 %v986_v19, %v987_v23  ;;  %v1266_v28 = vpop.f32.mrf.mxu0  ;;  %v1336_v30 = vpop.f32.mrf.mxu1 }
 0x12c   : > { %v1279_v34 = vrot.slane %v1266_v28, 3  ;;  %v1349_v48 = vrot.slane %v1336_v30, 4 }
 0x12d   : > { %v989_v31 = vrot.slane %v988_v27, 1  ;;  %v2198_v32 = vpop.f32.mrf.mxu0  ;;  %v2206_v35 = vpop.f32.mrf.mxu1 }
 0x12e   : > { %v1280_v44 = vsel %vm476_vm3, %v1278_v40, %v1279_v34  ;;  %v1350_v57 = vsel %vm548_vm4, %v1348_v53, %v1349_v48 }
 0x12f   : > { %v1403_v37 = vpop.f32.mrf.mxu0  ;;  %v990_v38 = vmax.f32 %v988_v27, %v989_v31  ;;  %v1473_v41 = vpop.f32.mrf.mxu1  ;;  %v1282_v51 = vadd.f32 %v1280_v44, %v1212_v46 }
 0x130   : > { %v1418_v54 = vrot.slane %v1403_v37, 5  ;;  %v1488_v2 = vrot.slane %v1473_v41, 6 }
 0x131   : > { %v2199_v42 = vpop.f32.mrf.mxu0  ;;  %991 = vst [vmem:[%s2649_s20] sm:$0x1] %v990_v38  ;;  %v2207_v45 = vpop.f32.mrf.mxu1  ;;  %v1352_v60 = vadd.f32 %v1350_v57, %v1282_v51 }
 0x133   : > { %v1406_v47 = vpop.f32.mrf.mxu0  ;;  %v1476_v50 = vpop.f32.mrf.mxu1 }
 0x134   : > { %v1419_v49 = vrot.slane %v1406_v47, 5  ;;  %v1489_v62 = vrot.slane %v1476_v50, 6 }
 0x135   : > { %v2214_v52 = vpop.f32.mrf.mxu0  ;;  %v2222_v55 = vpop.f32.mrf.mxu1 }
 0x136   : > { %v1420_v58 = vsel %vm620_vm5, %v1418_v54, %v1419_v49  ;;  %v1490_v8 = vsel %vm692_vm6, %v1488_v2, %v1489_v62 }
 0x137   : > { %v1543_v56 = vpop.f32.mrf.mxu0  ;;  %v1613_v59 = vpop.f32.mrf.mxu1  ;;  %v1422_v0 = vadd.f32 %v1420_v58, %v1352_v60 }
 0x138   : > { %v1558_v3 = vrot.slane %v1543_v56, 7 }
 0x139   : > { %v2215_v61 = vpop.f32.mrf.mxu0  ;;  %v2223_v63 = vpop.f32.mrf.mxu1  ;;  %v1492_v11 = vadd.f32 %v1490_v8, %v1422_v0 }
 0x13b   : > { %v1546_v1 = vpop.f32.mrf.mxu0  ;;  %v1615_v6 = vpop.f32.mrf.mxu1 }
 0x13c   : > { %v1559_v4 = vrot.slane %v1546_v1, 7 }
 0x13d   : > { %v2230_v7 = vpop.f32.mrf.mxu0  ;;  %v2238_v10 = vpop.f32.mrf.mxu1 }
 0x13e   : > { %v1560_v9 = vsel %vm764_vm7, %v1558_v3, %v1559_v4  ;;  %v1692_v18 = vrot.slane %v2230_v7, 1  ;;  %v1762_v23 = vrot.slane %v2238_v10, 2 }
 0x13f   : > { %v1676_v12 = vpop.f32.mrf.mxu0  ;;  %v1746_v13 = vpop.f32.mrf.mxu1  ;;  %v1562_v14 = vadd.f32 %v1560_v9, %v1492_v11 }
 0x141   : > { %v2231_v15 = vpop.f32.mrf.mxu0  ;;  %v2239_v16 = vpop.f32.mrf.mxu1  ;;  %v1625_v21 = vadd.f32 %v1615_v6, %v1562_v14 }
 0x143   : > { %v1678_v17 = vpop.f32.mrf.mxu0  ;;  %v1748_v20 = vpop.f32.mrf.mxu1 }
 0x144   : > { %v1691_v19 = vrot.slane %v1678_v17, 1  ;;  %v1761_v22 = vrot.slane %v1748_v20, 2 }
 0x146   : > { %v1693_v24 = vsel %vm332_vm1, %v1691_v19, %v1692_v18  ;;  %v1763_v26 = vsel %vm404_vm2, %v1761_v22, %v1762_v23 }
 0x147   : > { %v1695_v25 = vadd.f32 %v1693_v24, %v1625_v21 }
 0x149   : > { %v1765_v27 = vadd.f32 %v1763_v26, %v1695_v25 }
 0x14b   : > { %v1773_v28 = vadd.f32 %v2642_v5, %v1765_v27 }
 0x14d   : > { %v1774_v29 = vmax.f32 %v1773_v28, 0.0 }
 0x14f   : > { %v1775_v30 = vrot.slane %v1774_v29, 4 }
 0x151   : > { %v1776_v31 = vmax.f32 %v1774_v29, %v1775_v30 }
 0x153   : > { %v1777_v32 = vrot.slane %v1776_v31, 2 }
 0x155   : > { %v1778_v33 = vmax.f32 %v1776_v31, %v1777_v32 }
 0x157   : > { %v1779_v34 = vrot.slane %v1778_v33, 1 }
 0x159   : > { %v1780_v35 = vmax.f32 %v1778_v33, %v1779_v34 }
 0x15b   : > { %1781 = vst [vmem:[%s2649_s20 + $0x1] sm:$0x1] %v1780_v35 }
 0x15c   : > { %2380 = shalt.err (!%p2377_p0)
}
 0x15d   : > { %s2381_s6 = scalar_lea.hbm %s1794_s28, 32  ;;  %s2385_s9 = scalar_lea.hbm %s2701_s3, 64 }
 0x15e   : > { %p2382_p1 = scmp.ne.s32.totalorder %s1794_s28, %s2381_s6  ;;  %p2386_p4 = scmp.lt.s32.totalorder %s1794_s28, %s2701_s3 }
 0x15f   : > { %p2387_p7 = scmp.lt.s32.totalorder %s2385_s9, %s2381_s6 }
 0x160   : > { %p2383_p2 = pnand %p2382_p1, %p2495_p5 }
 0x161   : > { %p2388_p8 = por %p2387_p7, %p2386_p4 }
 0x162   : > { %p2384_p3 = pneg %p2383_p2 }
 0x164   : > { %p2389_p6 = pnand %p2388_p8, %p2384_p3 }
 0x166   : > { %2392 = shalt.err (!%p2389_p6)
}
 0x167   : > { %2245 = dma.vmem_to_hbm [thread:$0]  (%p2495_p5), %s1797_s25, 32, %s1794_s28, %s1783_s29  }
 0x168 PF: > { %p2257_p9 = scmp.ge.s32.totalorder %s2431_s15, 2  ;;  %s1808_s17 = sand.u32 1, %s2419_s12  }
 0x169   : > { %p2705_p10 = scmp.ne.s32.totalorder %s2703_s23, 0  ;;  %s1809_s19 = scalar_lea.sflag [#allocation4], %s1808_s17 }
 0x16b   : > { %p2252_p11 = pnand %p2257_p9, %p2705_p10 }
 0x16d   : > { %p2253_p12 = pneg %p2252_p11 }
 0x16f   : > { %2414 = dma.done.wait (%p2253_p12), %s1809_s19, 32  }
 0x170   : > { %2416 = vsyncadd (%p2253_p12), %s1809_s19, 4294967264  ;;  %p14_p13 = scmp.ge.s32.totalorder %s2482_s18, 4   ;;  %s2706_s12 = smov %s2423_s13 }
 0x171   : > { %s2707_s13 = smov %s2427_s14  ;;  %s2708_s14 = smov %s2493_s21 }
 0x172   : > { %s2709_s15 = smov %s2482_s18  ;;  %16 = sbr.rel (!%p14_p13) target bundleno = 4 (0x4), region = 83 }
 0x177   :  { %1814 = vsyncpa [#allocation3], 1 }
 0x178   :  { %1816 = vsyncpa [#allocation3 + $0x1], 1 }
 0x179   :  { %1817 = vsyncpa [#allocation4], 1 }
 0x17a   :  { %1819 = vsyncpa [#allocation4 + $0x1], 1 }

</bundles_post_ra>
